<compile_context>
chip_gen: v5e
topology: v5e:2x2
jax: 0.10.0
libtpu: 0.0.40
codegen_flags: <defaults>
</compile_context>

<pallas_src>
import jax
import jax.numpy as jnp
from jax.experimental import pallas as pl
from jax.experimental.pallas import tpu as pltpu


HIDDEN_DIMS = (256, 128, 64, 32)
BN_EPS = 1e-5
LANE = 128


def _round_up(n, m):
    return ((n + m - 1) // m) * m


# ----------------------------------------------------------------------------
# Kernel
# ----------------------------------------------------------------------------
def _fraud_net_kernel(
    x_ref,                      # (D0_pad, TB) bf16 -- batch on the lane axis
    w1_ref, b1_ref,             # (256, D0_pad) bf16, (256, 1) f32
    w2_ref, b2_ref,             # (128, 256)    bf16, (128, 1) f32
    w3_ref, b3_ref,             # (128, 128)    bf16, (128, 1) f32  (64 real)
    w4_ref, b4_ref,             # (128, 128)    bf16, (128, 1) f32  (32 real)
    w5_ref, b5_ref,             # (8, 128)      bf16 (row 0 real), (1, 1) f32
    o_ref,                      # (1, 1, TB) f32
):
    """Fused forward for one batch tile, all matmuls with N = batch_tile."""

    def block(h_bf16, w_ref, b_ref):
        # MXU matmul (bf16 in, f32 acc), bias + ReLU in f32, back to bf16.
        z = jnp.dot(w_ref[...], h_bf16, preferred_element_type=jnp.float32)
        z = z + b_ref[...]                      # (out, 1) broadcast over lanes
        return jnp.maximum(z, 0.0).astype(jnp.bfloat16)

    h = block(x_ref[...], w1_ref, b1_ref)       # (256, TB)
    h = block(h, w2_ref, b2_ref)                # (128, TB)
    h = block(h, w3_ref, b3_ref)                # (128, TB)  (64 real + 0 pads)
    h = block(h, w4_ref, b4_ref)                # (128, TB)  (32 real + 0 pads)

    # Final Linear(32 -> 1): (8, 128) @ (128, TB) -> (8, TB); row 0 is real.
    logits = jnp.dot(w5_ref[...], h, preferred_element_type=jnp.float32)
    logits = logits[0:1, :] + b5_ref[...]       # (1, TB)
    o_ref[...] = jax.nn.sigmoid(logits)[None].astype(o_ref.dtype)  # (1, 1, TB)


# ----------------------------------------------------------------------------
# Parameters (PyTorch-style init) and pure-JAX reference
# ----------------------------------------------------------------------------
def init_params(key, input_dim, hidden_dims=HIDDEN_DIMS):
    """Raw PyTorch-style DeepFraudNet params (eval-mode BatchNorm stats).

    Linear weights use uniform(-1/sqrt(fan_in), 1/sqrt(fan_in)); stored (in, out).
    """
    blocks = []
    prev = input_dim
    for h in hidden_dims:
        key, kw, kb, kg, kbeta = jax.random.split(key, 5)
        bound = 1.0 / float(prev) ** 0.5
        blocks.append(dict(
            w=jax.random.uniform(kw, (prev, h), jnp.float32, -bound, bound),
            b=jax.random.uniform(kb, (h,), jnp.float32, -bound, bound),
            gamma=1.0 + 0.01 * jax.random.normal(kg, (h,), jnp.float32),
            beta=0.01 * jax.random.normal(kbeta, (h,), jnp.float32),
            mean=jnp.zeros((h,), jnp.float32),
            var=jnp.ones((h,), jnp.float32),
        ))
        prev = h
    key, kw, kb = jax.random.split(key, 3)
    bound = 1.0 / float(prev) ** 0.5
    w_out = jax.random.uniform(kw, (prev, 1), jnp.float32, -bound, bound)
    b_out = jax.random.uniform(kb, (1,), jnp.float32, -bound, bound)
    return dict(blocks=blocks, w_out=w_out, b_out=b_out)


def reference_forward(x, raw):
    """Plain-JAX f32 reference with PyTorch eval-mode semantics."""
    h = x
    for blk in raw["blocks"]:
        z = h @ blk["w"] + blk["b"]
        z = blk["gamma"] * (z - blk["mean"]) / jnp.sqrt(blk["var"] + BN_EPS) + blk["beta"]
        h = jnp.maximum(z, 0.0)
    return jax.nn.sigmoid(h @ raw["w_out"] + raw["b_out"])


def prepare_params(raw):
    """Fold BN into the Linears, transpose weights to (out, in), zero-pad all
    feature dims to multiples of 128 and cast weights to bf16 (biases f32).

    Returns ([w1,b1,...,w4,b4,w5_rows,b5], padded input dim).
    """
    params = []
    in_dim = raw["blocks"][0]["w"].shape[0]
    d0_padded = _round_up(in_dim, LANE)
    prev_p = d0_padded
    for blk in raw["blocks"]:
        d_in, d_out = blk["w"].shape
        out_p = _round_up(d_out, LANE)
        scale = blk["gamma"] / jnp.sqrt(blk["var"] + BN_EPS)    # (d_out,)
        shift = blk["beta"] - blk["mean"] * scale               # (d_out,)
        w_f = (blk["w"] * scale[None, :]).T                     # (out, in), BN folded
        b_f = blk["b"] * scale + shift
        w_pad = jnp.zeros((out_p, prev_p), jnp.float32).at[:d_out, :d_in].set(w_f)
        b_pad = jnp.zeros((out_p, 1), jnp.float32).at[:d_out, 0].set(b_f)
        params.extend([w_pad.astype(jnp.bfloat16), b_pad])
        prev_p = out_p
    d_last = raw["w_out"].shape[0]
    # Final weight as row 0 of an (8, prev_p) slab (rows 1..7 zero).
    w5_rows = jnp.zeros((8, prev_p), jnp.float32).at[0, :d_last].set(raw["w_out"][:, 0])
    b5 = raw["b_out"].reshape(1, 1).astype(jnp.float32)
    params.extend([w5_rows.astype(jnp.bfloat16), b5])
    return params, d0_padded


# ----------------------------------------------------------------------------
# Wrapper
# ----------------------------------------------------------------------------
def _pick_batch_tile(batch, requested):
    """Lane-aligned batch tile, preferring >= 2 grid steps (v7x megacore)."""
    b_pad_min = _round_up(batch, LANE)
    tb = _round_up(max(LANE, min(requested, b_pad_min)), LANE)
    if b_pad_min // tb < 2 and b_pad_min >= 2 * LANE:
        # A 1-step grid would leave one v7x TensorCore idle; split in two.
        tb = _round_up(-(-b_pad_min // 2), LANE)
    return tb


def _vmem_limit_bytes(tb, d_in_padded):
    """Rough per-step VMEM footprint with headroom (clamped for v7x's 64 MiB)."""
    acts = tb * 4 * (256 + 3 * 128) * 2            # f32 intermediates + bf16 copies
    io = 2 * (d_in_padded * tb * 2) + 2 * (tb * 4)  # double-buffered x + out blocks
    est = acts + io + (2 << 20)                    # params + Mosaic scratch margin
    return int(min(max(int(1.5 * est), 32 << 20), 56 << 20))


def fraud_net_forward(x, params, d_in_padded, *, batch_tile=2048):
    """Run the fused DeepFraudNet forward pass.

    x: (B, D_in) f32.  params: output of prepare_params.  The batch is padded
    up to a multiple of the (lane-aligned) tile; padded rows are dropped.
    """
    B, D_in = x.shape
    assert D_in <= d_in_padded and params[0].shape[1] == d_in_padded

    tb = _pick_batch_tile(B, batch_tile)
    b_pad = _round_up(B, tb)
    num_tiles = b_pad // tb

    # Pad + transpose + cast in one fusion, writing bf16 directly
    # (batch on the lane axis: x_t is (D0_pad, B_pad)).
    x_t = jnp.zeros((d_in_padded, b_pad), jnp.bfloat16)
    x_t = x_t.at[:D_in, :B].set(x.T.astype(jnp.bfloat16))

    x_spec = pl.BlockSpec((d_in_padded, tb), lambda i: (0, i))
    # Parameters (~0.5 MiB total) have a constant block index, so they stay
    # resident in VMEM across grid steps.
    param_specs = [pl.BlockSpec(p.shape, lambda i: (0, 0)) for p in params]
    # Lane-dense output: one (1, 1, tb) row per grid step.
    out_spec = pl.BlockSpec((1, 1, tb), lambda i: (i, 0, 0))

    # Advisory cost for XLA scheduling around the custom call.
    flops_per_row = 2 * (d_in_padded * 256 + 256 * 128 + 128 * 128 + 128 * 128 + 128 * 8)
    param_bytes = sum(int(p.size) * p.dtype.itemsize for p in params)
    cost = pl.CostEstimate(
        flops=int(flops_per_row * b_pad),
        transcendentals=int(b_pad),                       # sigmoid
        bytes_accessed=int(b_pad * (d_in_padded * 2 + 4) + param_bytes),
    )

    out = pl.pallas_call(
        _fraud_net_kernel,
        out_shape=jax.ShapeDtypeStruct((num_tiles, 1, tb), jnp.float32),
        grid_spec=pltpu.PrefetchScalarGridSpec(
            num_scalar_prefetch=0,
            grid=(num_tiles,),
            in_specs=[x_spec] + param_specs,
            out_specs=out_spec,
        ),
        compiler_params=pltpu.CompilerParams(
            dimension_semantics=("parallel",),            # batch axis: shard TCs
            vmem_limit_bytes=_vmem_limit_bytes(tb, d_in_padded),
        ),
        cost_estimate=cost,
    )(x_t, *params)

    # Flatten the lane-dense result, drop batch padding, match module's (B, 1).
    return out.reshape(-1)[:B].reshape(B, 1)


# ----------------------------------------------------------------------------
# Demo / correctness check
# ----------------------------------------------------------------------------
if __name__ == "__main__":
    key = jax.random.PRNGKey(0)
    key, kp, kx1, kx2 = jax.random.split(key, 4)

    D_in = 30                      # deliberately non-lane-aligned feature dim
    raw = init_params(kp, D_in)
    params, d_in_p = prepare_params(raw)

    # Small, non-aligned batch (single grid step, tile capped to 128).
    x_small = jax.random.normal(kx1, (100, D_in), jnp.float32)
    out_small = jax.block_until_ready(fraud_net_forward(x_small, params, d_in_p))
    ref_small = reference_forward(x_small, raw)
    assert out_small.shape == (100, 1)
    # bf16 matmul inputs -> loosened tolerance vs the pure-f32 reference.
    assert jnp.allclose(out_small, ref_small, atol=3e-2, rtol=3e-2), "mismatch (small)"

    # Larger non-aligned batch: exercises the tile picker and a >=2-step grid.
    x_big = jax.random.normal(kx2, (384, D_in), jnp.float32)
    out_big = jax.block_until_ready(fraud_net_forward(x_big, params, d_in_p))
    ref_big = reference_forward(x_big, raw)
    assert out_big.shape == (384, 1)
    assert jnp.allclose(out_big, ref_big, atol=3e-2, rtol=3e-2), "mismatch (big)"

    print("KERNEL_OK")
</pallas_src>

<mosaic_0001>
module attributes {stable_mosaic.version = 11 : i64} {
  func.func @_fraud_net_kernel(%arg0: i32, %arg1: memref<128x128xbf16, #tpu.memory_space<vmem>>, %arg2: memref<256x128xbf16, #tpu.memory_space<vmem>>, %arg3: memref<256x1xf32, #tpu.memory_space<vmem>>, %arg4: memref<128x256xbf16, #tpu.memory_space<vmem>>, %arg5: memref<128x1xf32, #tpu.memory_space<vmem>>, %arg6: memref<128x128xbf16, #tpu.memory_space<vmem>>, %arg7: memref<128x1xf32, #tpu.memory_space<vmem>>, %arg8: memref<128x128xbf16, #tpu.memory_space<vmem>>, %arg9: memref<128x1xf32, #tpu.memory_space<vmem>>, %arg10: memref<8x128xbf16, #tpu.memory_space<vmem>>, %arg11: memref<1x1xf32, #tpu.memory_space<vmem>>, %arg12: memref<1x1x128xf32, #tpu.memory_space<vmem>>) attributes {dimension_semantics = [#tpu.dimension_semantics<parallel>], iteration_bounds = array<i64: 1>, scalar_prefetch = 0 : i64, scratch_operands = 0 : i64, tpu.core_type = #tpu.core_type<tc>, window_params = [{transform_indices = @transform_0, window_bounds = array<i64: 128, 128>}, {pipeline_mode = #tpu.pipeline_mode<synchronous>, transform_indices = @transform_1, window_bounds = array<i64: 256, 128>}, {pipeline_mode = #tpu.pipeline_mode<synchronous>, transform_indices = @transform_2, window_bounds = array<i64: 256, 1>}, {pipeline_mode = #tpu.pipeline_mode<synchronous>, transform_indices = @transform_3, window_bounds = array<i64: 128, 256>}, {pipeline_mode = #tpu.pipeline_mode<synchronous>, transform_indices = @transform_4, window_bounds = array<i64: 128, 1>}, {pipeline_mode = #tpu.pipeline_mode<synchronous>, transform_indices = @transform_5, window_bounds = array<i64: 128, 128>}, {pipeline_mode = #tpu.pipeline_mode<synchronous>, transform_indices = @transform_6, window_bounds = array<i64: 128, 1>}, {pipeline_mode = #tpu.pipeline_mode<synchronous>, transform_indices = @transform_7, window_bounds = array<i64: 128, 128>}, {pipeline_mode = #tpu.pipeline_mode<synchronous>, transform_indices = @transform_8, window_bounds = array<i64: 128, 1>}, {pipeline_mode = #tpu.pipeline_mode<synchronous>, transform_indices = @transform_9, window_bounds = array<i64: 8, 128>}, {pipeline_mode = #tpu.pipeline_mode<synchronous>, transform_indices = @transform_10, window_bounds = array<i64: 1, 1>}, {transform_indices = @transform_11, window_bounds = array<i64: 1, 1, 128>}]} {
    %c0 = arith.constant 0 : index
    %c0_0 = arith.constant 0 : index
    %0 = vector.load %arg1[%c0, %c0_0] : memref<128x128xbf16, #tpu.memory_space<vmem>>, vector<128x128xbf16>
    %c0_1 = arith.constant 0 : index
    %c0_2 = arith.constant 0 : index
    %1 = vector.load %arg2[%c0_1, %c0_2] : memref<256x128xbf16, #tpu.memory_space<vmem>>, vector<256x128xbf16>
    %cst = arith.constant dense<0.000000e+00> : vector<256x128xf32>
    %2 = tpu.matmul %1, %0, %cst {dimension_numbers = #tpu.dot_dimension_numbers<[1], [0], [0], [1], [0, 0, 1, 1], [], []>} : vector<256x128xbf16>, vector<128x128xbf16>, vector<256x128xf32> -> vector<256x128xf32>
    %c0_3 = arith.constant 0 : index
    %c0_4 = arith.constant 0 : index
    %3 = vector.load %arg3[%c0_3, %c0_4] : memref<256x1xf32, #tpu.memory_space<vmem>>, vector<256x1xf32>
    %4 = vector.broadcast %3 : vector<256x1xf32> to vector<256x128xf32>
    %5 = arith.addf %2, %4 : vector<256x128xf32>
    %cst_5 = arith.constant 0.000000e+00 : f32
    %6 = vector.broadcast %cst_5 : f32 to vector<256x128xf32>
    %7 = arith.maximumf %5, %6 : vector<256x128xf32>
    %8 = arith.truncf %7 : vector<256x128xf32> to vector<256x128xbf16>
    %c0_6 = arith.constant 0 : index
    %c0_7 = arith.constant 0 : index
    %9 = vector.load %arg4[%c0_6, %c0_7] : memref<128x256xbf16, #tpu.memory_space<vmem>>, vector<128x256xbf16>
    %cst_8 = arith.constant dense<0.000000e+00> : vector<128x128xf32>
    %10 = tpu.matmul %9, %8, %cst_8 {dimension_numbers = #tpu.dot_dimension_numbers<[1], [0], [0], [1], [0, 0, 1, 1], [], []>} : vector<128x256xbf16>, vector<256x128xbf16>, vector<128x128xf32> -> vector<128x128xf32>
    %c0_9 = arith.constant 0 : index
    %c0_10 = arith.constant 0 : index
    %11 = vector.load %arg5[%c0_9, %c0_10] : memref<128x1xf32, #tpu.memory_space<vmem>>, vector<128x1xf32>
    %12 = vector.broadcast %11 : vector<128x1xf32> to vector<128x128xf32>
    %13 = arith.addf %10, %12 : vector<128x128xf32>
    %cst_11 = arith.constant 0.000000e+00 : f32
    %14 = vector.broadcast %cst_11 : f32 to vector<128x128xf32>
    %15 = arith.maximumf %13, %14 : vector<128x128xf32>
    %16 = arith.truncf %15 : vector<128x128xf32> to vector<128x128xbf16>
    %c0_12 = arith.constant 0 : index
    %c0_13 = arith.constant 0 : index
    %17 = vector.load %arg6[%c0_12, %c0_13] : memref<128x128xbf16, #tpu.memory_space<vmem>>, vector<128x128xbf16>
    %cst_14 = arith.constant dense<0.000000e+00> : vector<128x128xf32>
    %18 = tpu.matmul %17, %16, %cst_14 {dimension_numbers = #tpu.dot_dimension_numbers<[1], [0], [0], [1], [0, 0, 1, 1], [], []>} : vector<128x128xbf16>, vector<128x128xbf16>, vector<128x128xf32> -> vector<128x128xf32>
    %c0_15 = arith.constant 0 : index
    %c0_16 = arith.constant 0 : index
    %19 = vector.load %arg7[%c0_15, %c0_16] : memref<128x1xf32, #tpu.memory_space<vmem>>, vector<128x1xf32>
    %20 = vector.broadcast %19 : vector<128x1xf32> to vector<128x128xf32>
    %21 = arith.addf %18, %20 : vector<128x128xf32>
    %cst_17 = arith.constant 0.000000e+00 : f32
    %22 = vector.broadcast %cst_17 : f32 to vector<128x128xf32>
    %23 = arith.maximumf %21, %22 : vector<128x128xf32>
    %24 = arith.truncf %23 : vector<128x128xf32> to vector<128x128xbf16>
    %c0_18 = arith.constant 0 : index
    %c0_19 = arith.constant 0 : index
    %25 = vector.load %arg8[%c0_18, %c0_19] : memref<128x128xbf16, #tpu.memory_space<vmem>>, vector<128x128xbf16>
    %cst_20 = arith.constant dense<0.000000e+00> : vector<128x128xf32>
    %26 = tpu.matmul %25, %24, %cst_20 {dimension_numbers = #tpu.dot_dimension_numbers<[1], [0], [0], [1], [0, 0, 1, 1], [], []>} : vector<128x128xbf16>, vector<128x128xbf16>, vector<128x128xf32> -> vector<128x128xf32>
    %c0_21 = arith.constant 0 : index
    %c0_22 = arith.constant 0 : index
    %27 = vector.load %arg9[%c0_21, %c0_22] : memref<128x1xf32, #tpu.memory_space<vmem>>, vector<128x1xf32>
    %28 = vector.broadcast %27 : vector<128x1xf32> to vector<128x128xf32>
    %29 = arith.addf %26, %28 : vector<128x128xf32>
    %cst_23 = arith.constant 0.000000e+00 : f32
    %30 = vector.broadcast %cst_23 : f32 to vector<128x128xf32>
    %31 = arith.maximumf %29, %30 : vector<128x128xf32>
    %32 = arith.truncf %31 : vector<128x128xf32> to vector<128x128xbf16>
    %c0_24 = arith.constant 0 : index
    %c0_25 = arith.constant 0 : index
    %33 = vector.load %arg10[%c0_24, %c0_25] : memref<8x128xbf16, #tpu.memory_space<vmem>>, vector<8x128xbf16>
    %cst_26 = arith.constant dense<0.000000e+00> : vector<8x128xf32>
    %34 = tpu.matmul %33, %32, %cst_26 {dimension_numbers = #tpu.dot_dimension_numbers<[1], [0], [0], [1], [0, 0, 1, 1], [], []>} : vector<8x128xbf16>, vector<128x128xbf16>, vector<8x128xf32> -> vector<8x128xf32>
    %35 = vector.extract_strided_slice %34 {offsets = [0, 0], sizes = [1, 128], strides = [1, 1]} : vector<8x128xf32> to vector<1x128xf32>
    %c0_27 = arith.constant 0 : index
    %c0_28 = arith.constant 0 : index
    %36 = vector.load %arg11[%c0_27, %c0_28] : memref<1x1xf32, #tpu.memory_space<vmem>>, vector<1x1xf32>
    %37 = vector.broadcast %36 : vector<1x1xf32> to vector<1x128xf32>
    %38 = arith.addf %35, %37 : vector<1x128xf32>
    %39 = arith.negf %38 : vector<1x128xf32>
    %40 = math.exp %39 : vector<1x128xf32>
    %cst_29 = arith.constant 1.000000e+00 : f32
    %41 = vector.broadcast %cst_29 : f32 to vector<1x128xf32>
    %42 = arith.addf %41, %40 : vector<1x128xf32>
    %43 = arith.divf %41, %42 : vector<1x128xf32>
    %44 = vector.shape_cast %43 : vector<1x128xf32> to vector<1x1x128xf32>
    %c0_30 = arith.constant 0 : index
    %c0_31 = arith.constant 0 : index
    %c0_32 = arith.constant 0 : index
    %45 = vector.load %arg12[%c0_30, %c0_31, %c0_32] : memref<1x1x128xf32, #tpu.memory_space<vmem>>, vector<1x1x128xf32>
    tpu.vector_store %arg12[%c0_30, %c0_31, %c0_32], %44 {strides = array<i32>} : memref<1x1x128xf32, #tpu.memory_space<vmem>>, vector<1x1x128xf32>,
    return
  }
  func.func @transform_0(%arg0: i32) -> (i32, i32) {
    %c0_i32 = arith.constant 0 : i32
    %c0_i32_0 = arith.constant 0 : i32
    return %c0_i32, %arg0 : i32, i32
  }
  func.func @transform_1(%arg0: i32) -> (i32, i32) {
    %c0_i32 = arith.constant 0 : i32
    %c0_i32_0 = arith.constant 0 : i32
    %c0_i32_1 = arith.constant 0 : i32
    return %c0_i32, %c0_i32_0 : i32, i32
  }
  func.func @transform_2(%arg0: i32) -> (i32, i32) {
    %c0_i32 = arith.constant 0 : i32
    %c0_i32_0 = arith.constant 0 : i32
    %c0_i32_1 = arith.constant 0 : i32
    return %c0_i32, %c0_i32_0 : i32, i32
  }
  func.func @transform_3(%arg0: i32) -> (i32, i32) {
    %c0_i32 = arith.constant 0 : i32
    %c0_i32_0 = arith.constant 0 : i32
    %c0_i32_1 = arith.constant 0 : i32
    return %c0_i32, %c0_i32_0 : i32, i32
  }
  func.func @transform_4(%arg0: i32) -> (i32, i32) {
    %c0_i32 = arith.constant 0 : i32
    %c0_i32_0 = arith.constant 0 : i32
    %c0_i32_1 = arith.constant 0 : i32
    return %c0_i32, %c0_i32_0 : i32, i32
  }
  func.func @transform_5(%arg0: i32) -> (i32, i32) {
    %c0_i32 = arith.constant 0 : i32
    %c0_i32_0 = arith.constant 0 : i32
    %c0_i32_1 = arith.constant 0 : i32
    return %c0_i32, %c0_i32_0 : i32, i32
  }
  func.func @transform_6(%arg0: i32) -> (i32, i32) {
    %c0_i32 = arith.constant 0 : i32
    %c0_i32_0 = arith.constant 0 : i32
    %c0_i32_1 = arith.constant 0 : i32
    return %c0_i32, %c0_i32_0 : i32, i32
  }
  func.func @transform_7(%arg0: i32) -> (i32, i32) {
    %c0_i32 = arith.constant 0 : i32
    %c0_i32_0 = arith.constant 0 : i32
    %c0_i32_1 = arith.constant 0 : i32
    return %c0_i32, %c0_i32_0 : i32, i32
  }
  func.func @transform_8(%arg0: i32) -> (i32, i32) {
    %c0_i32 = arith.constant 0 : i32
    %c0_i32_0 = arith.constant 0 : i32
    %c0_i32_1 = arith.constant 0 : i32
    return %c0_i32, %c0_i32_0 : i32, i32
  }
  func.func @transform_9(%arg0: i32) -> (i32, i32) {
    %c0_i32 = arith.constant 0 : i32
    %c0_i32_0 = arith.constant 0 : i32
    %c0_i32_1 = arith.constant 0 : i32
    return %c0_i32, %c0_i32_0 : i32, i32
  }
  func.func @transform_10(%arg0: i32) -> (i32, i32) {
    %c0_i32 = arith.constant 0 : i32
    %c0_i32_0 = arith.constant 0 : i32
    %c0_i32_1 = arith.constant 0 : i32
    return %c0_i32, %c0_i32_0 : i32, i32
  }
  func.func @transform_11(%arg0: i32) -> (i32, i32, i32) {
    %c0_i32 = arith.constant 0 : i32
    %c0_i32_0 = arith.constant 0 : i32
    %c0_i32_1 = arith.constant 0 : i32
    return %arg0, %c0_i32, %c0_i32_0 : i32, i32, i32
  }
}

</mosaic_0001>

<bundles_post_ra>
// kernel: tpu_custom_call.1
= control target key start
LH: loop header
LB: loop body
LE: loop exit
PB: predicated region body
PF: predicated region fallthrough
CT: control target
= control target key end

     0   :  { %s2389_s0 = inlined_call_operand.vmem [shape: bf16[128,128], index: 0, kind: input, shape index: {}]   ;;  %s2390_s1 = inlined_call_operand.vmem [shape: bf16[256,128], index: 1, kind: input, shape index: {}]   ;;  %s2391_s2 = inlined_call_operand.vmem [shape: f32[256,1], index: 2, kind: input, shape index: {}]   ;;  %s2392_s3 = inlined_call_operand.vmem [shape: bf16[128,256], index: 3, kind: input, shape index: {}]   ;;  %s2393_s4 = inlined_call_operand.vmem [shape: f32[128,1], index: 4, kind: input, shape index: {}]   ;;  %s2394_s5 = inlined_call_operand.vmem [shape: bf16[128,128], index: 5, kind: input, shape index: {}]   ;;  %s2395_s6 = inlined_call_operand.vmem [shape: f32[128,1], index: 6, kind: input, shape index: {}]   ;;  %s2396_s7 = inlined_call_operand.vmem [shape: bf16[128,128], index: 7, kind: input, shape index: {}]   ;;  %s2397_s8 = inlined_call_operand.vmem [shape: f32[128,1], index: 8, kind: input, shape index: {}]   ;;  %s2398_s9 = inlined_call_operand.vmem [shape: bf16[8,128], index: 9, kind: input, shape index: {}]   ;;  %s2399_s10 = inlined_call_operand.<no memory space> [shape: f32[1,1], index: 10, kind: input, shape index: {}]   ;;  %s2400_s11 = inlined_call_operand.hbm [shape: f32[1,1,128], index: 11, kind: output, shape index: {}]  }
   0x1   :  { %v16_v0 = vstv %s2399_s10 }
   0x2   :  { %17 = vst [vmem:[#allocation2] sm:$0x1] %v16_v0 }
   0x3   :  { %v103_v1 = vld [vmem:[%s2391_s2 + $0x70] sm:$0xff]  ;;  %v101_v2 = vld [vmem:[%s2391_s2 + $0x60] sm:$0xff]  ;;  %v1732_v4 = vmov 0   ;;  %v1632_v5 = vld [vmem:[%s2389_s0 + $0x38] sm:$0xff] }
   0x4   :  { %v99_v3 = vld [vmem:[%s2391_s2 + $0x50] sm:$0xff]  ;;  %1701 = vset.pattern.permute.xlu2 %v1732_v4  ;;  %1700 = vset.pattern.permute.xlu1 %v1732_v4  ;;  %v104_v7 = vld [vmem:[%s2391_s2 + $0x78] sm:$0xff]  ;;  %v102_v8 = vld [vmem:[%s2391_s2 + $0x68] sm:$0xff] }
   0x5   :  { %1699 = vset.pattern.permute.xlu0 %v1732_v4  ;;  %183 = vperm.xlu1 %1700, %v101_v2   ;;  %v1631_v6 = vld [vmem:[%s2389_s0 + $0x30] sm:$0xff]  ;;  %v100_v9 = vld [vmem:[%s2391_s2 + $0x58] sm:$0xff]  ;;  %v1630_v10 = vld [vmem:[%s2389_s0 + $0x28] sm:$0xff] }
   0x6   :  { %193 = vperm.xlu0 %1699, %v103_v1   ;;  %173 = vperm.xlu2 %1701, %v99_v3  }
   0x7   :  { %425 = vmatpush.bf16.msra.mxu0 %v1632_v5  ;;  %1681 = vmatpush.bf16.msra.mxu3 %v1632_v5 }
   0xb   :  { %426 = vmatpush.bf16.msra.mxu0 %v1631_v6  ;;  %1682 = vmatpush.bf16.msra.mxu3 %v1631_v6 }
   0xc   :  { %18 = vsyncpa [#allocation4], 0  ;;  %v1629_v11 = vld [vmem:[%s2389_s0 + $0x20] sm:$0xff]  ;;  %v98_v12 = vld [vmem:[%s2391_s2 + $0x48] sm:$0xff]  ;;  %s1391_s23 = sshll.u32 %s2400_s11, 4  ;;  %s1392_s23 = int_to_ptr.hbm [resolvable:$true] %s1391_s23 }
   0xd   :  { %188 = vperm.xlu1 %1700, %v102_v8   ;;  %v97_v13 = vld [vmem:[%s2391_s2 + $0x40] sm:$0xff]  ;;  %v95_v14 = vld [vmem:[%s2391_s2 + $0x30] sm:$0xff]  ;;  %v1628_v15 = vld [vmem:[%s2389_s0 + $0x18] sm:$0xff] }
   0xe   :  { %198 = vperm.xlu0 %1699, %v104_v7   ;;  %178 = vperm.xlu2 %1701, %v100_v9   ;;  %v1627_v16 = vld [vmem:[%s2389_s0 + $0x10] sm:$0xff]  ;;  %v93_v17 = vld [vmem:[%s2391_s2 + $0x20] sm:$0xff]  ;;  %v96_v18 = vld [vmem:[%s2391_s2 + $0x38] sm:$0xff] }
   0xf   :  { %427 = vmatpush.bf16.msra.mxu0 %v1630_v10  ;;  %1683 = vmatpush.bf16.msra.mxu3 %v1630_v10  ;;  %v94_v19 = vld [vmem:[%s2391_s2 + $0x28] sm:$0xff]  ;;  %v1625_v21 = vld [vmem:[%s2389_s0] sm:$0xff]  ;;  %v92_v22 = vld [vmem:[%s2391_s2 + $0x18] sm:$0xff] }
  0x10   :  { %v1626_v20 = vld [vmem:[%s2389_s0 + $0x8] sm:$0xff]  ;;  %v91_v23 = vld [vmem:[%s2391_s2 + $0x10] sm:$0xff]  ;;  %v89_v24 = vld [vmem:[%s2391_s2] sm:$0xff] }
  0x11   :  { %v1633_v25 = vld [vmem:[%s2390_s1] sm:$0xff]  ;;  %v119_v26 = vld [vmem:[%s2391_s2 + $0xf0] sm:$0xff]  ;;  %v90_v27 = vld [vmem:[%s2391_s2 + $0x8] sm:$0xff] }
  0x12   :  { %v120_v28 = vld [vmem:[%s2391_s2 + $0xf8] sm:$0xff]  ;;  %v118_v29 = vld [vmem:[%s2391_s2 + $0xe8] sm:$0xff]  ;;  %v117_v30 = vld [vmem:[%s2391_s2 + $0xe0] sm:$0xff] }
  0x13   :  { %428 = vmatpush.bf16.msra.mxu0 %v1629_v11  ;;  %1684 = vmatpush.bf16.msra.mxu3 %v1629_v11  ;;  %v115_v31 = vld [vmem:[%s2391_s2 + $0xd0] sm:$0xff]  ;;  %v1634_v32 = vld [vmem:[%s2390_s1 + $0x8] sm:$0xff]  ;;  %v113_v33 = vld [vmem:[%s2391_s2 + $0xc0] sm:$0xff] }
  0x14   :  { %v116_v34 = vld [vmem:[%s2391_s2 + $0xd8] sm:$0xff]  ;;  %v114_v35 = vld [vmem:[%s2391_s2 + $0xc8] sm:$0xff]  ;;  %v111_v37 = vld [vmem:[%s2391_s2 + $0xb0] sm:$0xff] }
  0x15   :  { %168 = vperm.xlu1 %1700, %v98_v12   ;;  %v112_v36 = vld [vmem:[%s2391_s2 + $0xb8] sm:$0xff]  ;;  %v109_v38 = vld [vmem:[%s2391_s2 + $0xa0] sm:$0xff]  ;;  %v1635_v39 = vld [vmem:[%s2390_s1 + $0x10] sm:$0xff] }
  0x16   :  { %163 = vperm.xlu0 %1699, %v97_v13   ;;  %153 = vperm.xlu2 %1701, %v95_v14   ;;  %v107_v40 = vld [vmem:[%s2391_s2 + $0x90] sm:$0xff]  ;;  %v110_v41 = vld [vmem:[%s2391_s2 + $0xa8] sm:$0xff]  ;;  %v108_v42 = vld [vmem:[%s2391_s2 + $0x98] sm:$0xff] }
  0x17   :  { %429 = vmatpush.bf16.msra.mxu0 %v1628_v15  ;;  %1685 = vmatpush.bf16.msra.mxu3 %v1628_v15  ;;  %v106_v43 = vld [vmem:[%s2391_s2 + $0x88] sm:$0xff]  ;;  %v105_v44 = vld [vmem:[%s2391_s2 + $0x80] sm:$0xff]  ;;  %v592_v45 = vld [vmem:[%s2393_s4 + $0x70] sm:$0xff] }
  0x18   :  { %v1636_v46 = vld [vmem:[%s2390_s1 + $0x18] sm:$0xff]  ;;  %v1646_v47 = vld [vmem:[%s2390_s1 + $0x68] sm:$0xff]  ;;  %v590_v48 = vld [vmem:[%s2393_s4 + $0x60] sm:$0xff] }
  0x19   :  { %v593_v49 = vld [vmem:[%s2393_s4 + $0x78] sm:$0xff]  ;;  %v591_v50 = vld [vmem:[%s2393_s4 + $0x68] sm:$0xff]  ;;  %v588_v52 = vld [vmem:[%s2393_s4 + $0x50] sm:$0xff] }
  0x1a   :  { %v589_v51 = vld [vmem:[%s2393_s4 + $0x58] sm:$0xff]  ;;  %v586_v53 = vld [vmem:[%s2393_s4 + $0x40] sm:$0xff]  ;;  %v1647_v55 = vld [vmem:[%s2390_s1 + $0x70] sm:$0xff] }
  0x1b   :  { %430 = vmatpush.bf16.msra.mxu0 %v1627_v16  ;;  %1686 = vmatpush.bf16.msra.mxu3 %v1627_v16  ;;  %v1637_v54 = vld [vmem:[%s2390_s1 + $0x20] sm:$0xff]  ;;  %v584_v56 = vld [vmem:[%s2393_s4 + $0x30] sm:$0xff]  ;;  %v587_v57 = vld [vmem:[%s2393_s4 + $0x48] sm:$0xff] }
  0x1c   :  { %v585_v58 = vld [vmem:[%s2393_s4 + $0x38] sm:$0xff]  ;;  %v583_v59 = vld [vmem:[%s2393_s4 + $0x28] sm:$0xff]  ;;  %v582_v60 = vld [vmem:[%s2393_s4 + $0x20] sm:$0xff] }
  0x1d   :  { %143 = vperm.xlu1 %1700, %v93_v17   ;;  %v580_v61 = vld [vmem:[%s2393_s4 + $0x10] sm:$0xff]  ;;  %v1638_v62 = vld [vmem:[%s2390_s1 + $0x28] sm:$0xff]  ;;  %v1648_v63 = vld [vmem:[%s2390_s1 + $0x78] sm:$0xff] }
  0x1e   :  { %158 = vperm.xlu0 %1699, %v96_v18   ;;  %148 = vperm.xlu2 %1701, %v94_v19   ;;  %v578_v1 = vld [vmem:[%s2393_s4] sm:$0xff]  ;;  %v581_v2 = vld [vmem:[%s2393_s4 + $0x18] sm:$0xff]  ;;  %v579_v3 = vld [vmem:[%s2393_s4 + $0x8] sm:$0xff] }
  0x1f   :  { %431 = vmatpush.bf16.msra.mxu0 %v1626_v20  ;;  %1687 = vmatpush.bf16.msra.mxu3 %v1626_v20  ;;  %v907_v5 = vld [vmem:[%s2395_s6 + $0x78] sm:$0xff]  ;;  %v906_v6 = vld [vmem:[%s2395_s6 + $0x70] sm:$0xff]  ;;  %v904_v7 = vld [vmem:[%s2395_s6 + $0x60] sm:$0xff] }
  0x20   :  { %v1639_v8 = vld [vmem:[%s2390_s1 + $0x30] sm:$0xff]  ;;  %v905_v11 = vld [vmem:[%s2395_s6 + $0x68] sm:$0xff]  ;;  %v903_v12 = vld [vmem:[%s2395_s6 + $0x58] sm:$0xff] }
  0x21   :  { %v902_v10 = vld [vmem:[%s2395_s6 + $0x50] sm:$0xff]  ;;  %v901_v15 = vld [vmem:[%s2395_s6 + $0x48] sm:$0xff]  ;;  %v900_v16 = vld [vmem:[%s2395_s6 + $0x40] sm:$0xff] }
  0x22   :  { %v898_v17 = vld [vmem:[%s2395_s6 + $0x30] sm:$0xff]  ;;  %v1640_v18 = vld [vmem:[%s2390_s1 + $0x38] sm:$0xff] }
  0x23   :  { %432 = vmatpush.bf16.msra.mxu0 %v1625_v21  ;;  %1688 = vmatpush.bf16.msra.mxu3 %v1625_v21 }
  0x25   :  { %138 = vperm.xlu1 %1700, %v92_v22   ;;  %v896_v22 = vld [vmem:[%s2395_s6 + $0x20] sm:$0xff] }
  0x26   :  { %133 = vperm.xlu0 %1699, %v91_v23   ;;  %123 = vperm.xlu2 %1701, %v89_v24   ;;  %v899_v23 = vld [vmem:[%s2395_s6 + $0x38] sm:$0xff]  ;;  %v897_v24 = vld [vmem:[%s2395_s6 + $0x28] sm:$0xff] }
  0x27   :  { %433 = vmatmul.bf16.vlgmr.msra.gmra.mxu0 %v1633_v25  ;;  %498 = vmatmul.bf16.vlgmr.msra.gmra.mxu3 %v1646_v47  ;;  %v1137_v47 = vld [vmem:[%s2397_s8 + $0x60] sm:$0xff] }
  0x2d   :  { %273 = vperm.xlu1 %1700, %v119_v26  }
  0x2e   :  { %128 = vperm.xlu0 %1699, %v90_v27   ;;  %278 = vperm.xlu2 %1701, %v120_v28   ;;  %v895_v28 = vld [vmem:[%s2395_s6 + $0x18] sm:$0xff] }
  0x35   :  { %268 = vperm.xlu1 %1700, %v118_v29   ;;  %v894_v29 = vld [vmem:[%s2395_s6 + $0x10] sm:$0xff] }
  0x36   :  { %263 = vperm.xlu0 %1699, %v117_v30   ;;  %253 = vperm.xlu2 %1701, %v115_v31   ;;  %v892_v30 = vld [vmem:[%s2395_s6] sm:$0xff] }
  0x37   :  { %438 = vmatmul.bf16.gmra.mxu0 %v1634_v32  ;;  %503 = vmatmul.bf16.gmra.mxu3 %v1647_v55  ;;  %v1641_v31 = vld [vmem:[%s2390_s1 + $0x40] sm:$0xff] }
  0x3d   :  { %243 = vperm.xlu1 %1700, %v113_v33  }
  0x3e   :  { %258 = vperm.xlu0 %1699, %v116_v34   ;;  %248 = vperm.xlu2 %1701, %v114_v35   ;;  %v1139_v35 = vld [vmem:[%s2397_s8 + $0x70] sm:$0xff] }
  0x45   :  { %238 = vperm.xlu1 %1700, %v112_v36  }
  0x46   :  { %233 = vperm.xlu0 %1699, %v111_v37   ;;  %223 = vperm.xlu2 %1701, %v109_v38   ;;  %v893_v37 = vld [vmem:[%s2395_s6 + $0x8] sm:$0xff]  ;;  %v1140_v38 = vld [vmem:[%s2397_s8 + $0x78] sm:$0xff]  ;;  %s1733_s6 = smov [#allocation3]  }
  0x47   :  { %443 = vmatmul.bf16.gmra.mxu0 %v1635_v39  ;;  %508 = vmatmul.bf16.gmra.mxu3 %v1648_v63  ;;  %v1129_v63 = vld [vmem:[%s2397_s8 + $0x20] sm:$0xff] }
  0x4d   :  { %213 = vperm.xlu1 %1700, %v107_v40  }
  0x4e   :  { %228 = vperm.xlu0 %1699, %v110_v41   ;;  %218 = vperm.xlu2 %1701, %v108_v42  }
  0x55   :  { %208 = vperm.xlu1 %1700, %v106_v43  }
  0x56   :  { %203 = vperm.xlu0 %1699, %v105_v44   ;;  %666 = vperm.xlu2 %1701, %v592_v45  }
  0x57   :  { %448 = vmatmul.bf16.gmra.mxu0 %v1636_v46  ;;  %v1138_v46 = vld [vmem:[%s2397_s8 + $0x68] sm:$0xff] }
  0x5d   :  { %656 = vperm.xlu1 %1700, %v590_v48   ;;  %v1135_v48 = vld [vmem:[%s2397_s8 + $0x50] sm:$0xff] }
  0x5e   :  { %671 = vperm.xlu0 %1699, %v593_v49   ;;  %661 = vperm.xlu2 %1701, %v591_v50   ;;  %v1642_v49 = vld [vmem:[%s2390_s1 + $0x48] sm:$0xff] }
  0x60   :  { %v1994_v4 = vpop.permute.xlu2 %173 }
  0x65   :  { %651 = vperm.xlu1 %1700, %v589_v51   ;;  %v1133_v51 = vld [vmem:[%s2397_s8 + $0x40] sm:$0xff] }
  0x66   :  { %646 = vperm.xlu0 %1699, %v588_v52   ;;  %636 = vperm.xlu2 %1701, %v586_v53   ;;  %v1136_v53 = vld [vmem:[%s2397_s8 + $0x58] sm:$0xff] }
  0x67   :  { %453 = vmatmul.bf16.gmra.mxu0 %v1637_v54  ;;  %v1134_v54 = vld [vmem:[%s2397_s8 + $0x48] sm:$0xff] }
  0x68   :  { %v2019_v13 = vpop.permute.xlu2 %178 }
  0x6d   :  { %626 = vperm.xlu1 %1700, %v584_v56  }
  0x6e   :  { %641 = vperm.xlu0 %1699, %v587_v57   ;;  %631 = vperm.xlu2 %1701, %v585_v58  }
  0x70   :  { %v2037_v20 = vpop.permute.xlu2 %153 }
  0x75   :  { %621 = vperm.xlu1 %1700, %v583_v59  }
  0x76   :  { %616 = vperm.xlu0 %1699, %v582_v60   ;;  %606 = vperm.xlu2 %1701, %v580_v61   ;;  %v1132_v61 = vld [vmem:[%s2397_s8 + $0x38] sm:$0xff] }
  0x77   :  { %458 = vmatmul.bf16.gmra.mxu0 %v1638_v62  ;;  %v2035_v19 = vpop.permute.xlu1 %183  ;;  %v1131_v62 = vld [vmem:[%s2397_s8 + $0x30] sm:$0xff] }
  0x78   :  { %v1983_v0 = vpop.permute.xlu0 %193  ;;  %v2052_v26 = vpop.permute.xlu2 %148 }
  0x7d   :  { %596 = vperm.xlu1 %1700, %v578_v1   ;;  %v1643_v1 = vld [vmem:[%s2390_s1 + $0x50] sm:$0xff] }
  0x7e   :  { %611 = vperm.xlu0 %1699, %v581_v2   ;;  %601 = vperm.xlu2 %1701, %v579_v3   ;;  %v1127_v3 = vld [vmem:[%s2397_s8 + $0x10] sm:$0xff] }
  0x7f   :  { %v2050_v25 = vpop.permute.xlu1 %188 }
  0x80   :  { %v2008_v9 = vpop.permute.xlu0 %198  ;;  %v124_v34 = vpop.permute.xlu2 %123 }
  0x85   :  { %985 = vperm.xlu1 %1700, %v907_v5  }
  0x86   :  { %980 = vperm.xlu0 %1699, %v906_v6   ;;  %970 = vperm.xlu2 %1701, %v904_v7   ;;  %v1130_v6 = vld [vmem:[%s2397_s8 + $0x28] sm:$0xff]  ;;  %v1128_v7 = vld [vmem:[%s2397_s8 + $0x18] sm:$0xff] }
  0x87   :  { %463 = vmatmul.bf16.gmra.mxu0 %v1639_v8  ;;  %v2066_v33 = vpop.permute.xlu1 %168 }
  0x88   :  { %v2021_v14 = vpop.permute.xlu0 %163 }
  0x8d   :  { %960 = vperm.xlu1 %1700, %v902_v10  }
  0x8e   :  { %975 = vperm.xlu0 %1699, %v905_v11   ;;  %965 = vperm.xlu2 %1701, %v903_v12  }
  0x8f   :  { %v144_v45 = vpop.permute.xlu1 %143 }
  0x90   :  { %v2039_v21 = vpop.permute.xlu0 %158 }
  0x95   :  { %955 = vperm.xlu1 %1700, %v901_v15  }
  0x96   :  { %950 = vperm.xlu0 %1699, %v900_v16   ;;  %940 = vperm.xlu2 %1701, %v898_v17   ;;  %v1126_v16 = vld [vmem:[%s2397_s8 + $0x8] sm:$0xff]  ;;  %v1125_v17 = vld [vmem:[%s2397_s8] sm:$0xff] }
  0x97   :  { %468 = vmatmul.bf16.gmra.mxu0 %v1640_v18  ;;  %v139_v55 = vpop.permute.xlu1 %138  ;;  %v1356_v18 = vld [vmem:[#allocation2] sm:$0x1] }
  0x98   :  { %v134_v27 = vpop.permute.xlu0 %133 }
  0x9d   :  { %930 = vperm.xlu1 %1700, %v896_v22   ;;  %v1644_v22 = vld [vmem:[%s2390_s1 + $0x58] sm:$0xff] }
  0x9e   :  { %945 = vperm.xlu0 %1699, %v899_v23   ;;  %935 = vperm.xlu2 %1701, %v897_v24  }
  0xa0   :  { %v129_v39 = vpop.permute.xlu0 %128 }
  0xa4   :  { %v434_v32 = vpop.f32.mrf.mxu0 }
  0xa5   :  { %925 = vperm.xlu1 %1700, %v895_v28   ;;  %v435_v36 = vadd.f32 %v434_v32, %v124_v34 }
  0xa6   :  { %920 = vperm.xlu0 %1699, %v894_v29   ;;  %910 = vperm.xlu2 %1701, %v892_v30  }
  0xa7   :  { %473 = vmatmul.bf16.gmra.mxu0 %v1641_v31  ;;  %v514_v42 = vmax.f32 %v435_v36, 0.0  ;;  %v1645_v31 = vld [vmem:[%s2390_s1 + $0x60] sm:$0xff]  ;;  %v274_v36 = vpop.permute.xlu1 %273 }
  0xac   :  { %v436_v40 = vpop.f32.mrf.mxu0 }
  0xad   :  { %v437_v41 = vadd.f32 %v436_v40, %v129_v39  ;;  %1213 = vperm.xlu1 %1700, %v1139_v35  }
  0xae   :  { %915 = vperm.xlu0 %1699, %v893_v37   ;;  %1218 = vperm.xlu2 %1701, %v1140_v38   ;;  %v2142_v38 = vpop.f32.mrf.mxu3 }
  0xaf   :  { %v515_v43 = vmax.f32 %v437_v41, 0.0  ;;  %v269_v39 = vpop.permute.xlu1 %268 }
  0xb1   :  { %v2077_v44 = vpack.c.bf16 %v515_v43, %v514_v42 }
  0xb4   :  { %v439_v50 = vpop.f32.mrf.mxu0 }
  0xb5   :  { %1208 = vperm.xlu1 %1700, %v1138_v46   ;;  %v440_v52 = vadd.f32 %v439_v50, %v134_v27 }
  0xb6   :  { %1203 = vperm.xlu0 %1699, %v1137_v47   ;;  %1193 = vperm.xlu2 %1701, %v1135_v48  }
  0xb7   :  { %478 = vmatmul.bf16.gmra.mxu0 %v1642_v49  ;;  %v516_v58 = vmax.f32 %v440_v52, 0.0  ;;  %v2148_v43 = vpop.permute.xlu1 %243 }
  0xbc   :  { %v441_v56 = vpop.f32.mrf.mxu0 }
  0xbd   :  { %v442_v57 = vadd.f32 %v441_v56, %v139_v55  ;;  %1183 = vperm.xlu1 %1700, %v1133_v51  }
  0xbe   :  { %1198 = vperm.xlu0 %1699, %v1136_v53   ;;  %1188 = vperm.xlu2 %1701, %v1134_v54  }
  0xbf   :  { %v517_v59 = vmax.f32 %v442_v57, 0.0  ;;  %v2152_v48 = vpop.permute.xlu1 %238 }
  0xc1   :  { %v2100_v60 = vpack.c.bf16 %v517_v59, %v516_v58 }
  0xc4   :  { %v444_v2 = vpop.f32.mrf.mxu0 }
  0xc5   :  { %1178 = vperm.xlu1 %1700, %v1132_v61   ;;  %v445_v5 = vadd.f32 %v444_v2, %v144_v45 }
  0xc6   :  { %1173 = vperm.xlu0 %1699, %v1131_v62   ;;  %1163 = vperm.xlu2 %1701, %v1129_v63  }
  0xc7   :  { %483 = vmatmul.bf16.gmra.mxu0 %v1643_v1  ;;  %v518_v11 = vmax.f32 %v445_v5, 0.0  ;;  %v2161_v62 = vpop.permute.xlu1 %213 }
  0xcc   :  { %v446_v8 = vpop.f32.mrf.mxu0 }
  0xcd   :  { %v447_v10 = vadd.f32 %v446_v8, %v2052_v26  ;;  %1153 = vperm.xlu1 %1700, %v1127_v3  }
  0xce   :  { %1168 = vperm.xlu0 %1699, %v1130_v6   ;;  %1158 = vperm.xlu2 %1701, %v1128_v7  }
  0xcf   :  { %v519_v12 = vmax.f32 %v447_v10, 0.0 }
  0xd1   :  { %v2124_v15 = vpack.c.bf16 %v519_v12, %v518_v11 }
  0xd4   :  { %v449_v23 = vpop.f32.mrf.mxu0 }
  0xd5   :  { %1148 = vperm.xlu1 %1700, %v1126_v16   ;;  %v450_v24 = vadd.f32 %v449_v23, %v2037_v20  ;;  %v264_v20 = vpop.permute.xlu0 %263 }
  0xd6   :  { %1143 = vperm.xlu0 %1699, %v1125_v17   ;;  %1359 = vperm.xlu2 %1701, %v1356_v18   ;;  %v279_v18 = vpop.permute.xlu2 %278 }
  0xd7   :  { %488 = vmatmul.bf16.gmra.mxu0 %v1644_v22  ;;  %v520_v28 = vmax.f32 %v450_v24, 0.0 }
  0xdc   :  { %v451_v26 = vpop.f32.mrf.mxu0 }
  0xdd   :  { %v452_v27 = vadd.f32 %v451_v26, %v2039_v21  ;;  %v2144_v21 = vpop.f32.mrf.mxu3  ;;  %v2146_v41 = vpop.permute.xlu0 %258 }
  0xdf   :  { %v521_v29 = vmax.f32 %v452_v27, 0.0 }
  0xe1   :  { %v2137_v30 = vpack.c.bf16 %v521_v29, %v520_v28 }
  0xe4   :  { %v454_v32 = vpop.f32.mrf.mxu0 }
  0xe5   :  { %v504_v46 = vpop.f32.mrf.mxu3  ;;  %v2150_v47 = vpop.permute.xlu0 %233  ;;  %v455_v2 = vadd.f32 %v454_v32, %v2021_v14  ;;  %v1498_v32 = vld [vmem:[%s2392_s3] sm:$0xf] }
  0xe6   :  { %v505_v27 = vadd.f32 %v504_v46, %v264_v20  ;;  %v502_v20 = vadd.f32 %v2144_v21, %v2146_v41  ;;  %v1506_v21 = vld [vmem:[%s2392_s3 + $0x10] sm:$0xf]  ;;  %v1652_v41 = vld [vmem:[%s2392_s3 + $0x14] sm:$0xf0] }
  0xe7   :  { %493 = vmatmul.bf16.gmra.mxu0 %v1645_v31  ;;  %v522_v8 = vmax.f32 %v455_v2, 0.0 }
  0xec   :  { %v456_v34 = vpop.f32.mrf.mxu0 }
  0xed   :  { %v506_v55 = vpop.f32.mrf.mxu3  ;;  %v2158_v57 = vpop.permute.xlu0 %228 }
  0xee   :  { %v507_v28 = vadd.f32 %v506_v55, %v269_v39 }
  0xf0   :  { %v543_v39 = vmax.f32 %v507_v28, 0.0 }
  0xf4   :  { %v459_v35 = vpop.f32.mrf.mxu0 }
  0xf5   :  { %v509_v5 = vpop.f32.mrf.mxu3  ;;  %v204_v7 = vpop.permute.xlu0 %203 }
  0xf6   :  { %v510_v24 = vadd.f32 %v509_v5, %v274_v36  ;;  %v1656_v5 = vld [vmem:[%s2392_s3 + $0x34] sm:$0xf0] }
  0xf8   :  { %v544_v29 = vmax.f32 %v510_v24, 0.0 }
  0xfc   :  { %v461_v37 = vpop.f32.mrf.mxu0 }
  0xfd   :  { %v462_v58 = vadd.f32 %v461_v37, %v2019_v13  ;;  %v511_v22 = vpop.f32.mrf.mxu3 }
  0xfe   :  { %v512_v26 = vadd.f32 %v511_v22, %v279_v18 }
 0x100   :  { %v545_v31 = vmax.f32 %v512_v26, 0.0 }
 0x104   :  { %v464_v40 = vpop.f32.mrf.mxu0 }
 0x105   :  { %v465_v53 = vadd.f32 %v464_v40, %v2035_v19  ;;  %v525_v19 = vmax.f32 %v462_v58, 0.0  ;;  %v561_v40 = vpack.c.bf16 %v545_v31, %v544_v29  ;;  %v1514_v58 = vld [vmem:[%s2392_s3 + $0x20] sm:$0xf] }
 0x107   :  { %v526_v63 = vmax.f32 %v465_v53, 0.0 }
 0x10c   :  { %v466_v42 = vpop.f32.mrf.mxu0 }
 0x10d   :  { %v467_v51 = vadd.f32 %v466_v42, %v2050_v25 }
 0x10f   :  { %v527_v59 = vmax.f32 %v467_v51, 0.0 }
 0x111   :  { %v552_v1 = vpack.c.bf16 %v527_v59, %v526_v63  ;;  %v1654_v59 = vld [vmem:[%s2392_s3 + $0x24] sm:$0xf0] }
 0x114   :  { %v469_v45 = vpop.f32.mrf.mxu0 }
 0x115   :  { %v470_v49 = vadd.f32 %v469_v45, %v1983_v0  ;;  %v460_v0 = vadd.f32 %v459_v35, %v1994_v4  ;;  %v209_v4 = vpop.permute.xlu1 %208  ;;  %v254_v35 = vpop.permute.xlu2 %253 }
 0x116   :  { %v500_v37 = vadd.f32 %v2142_v38, %v254_v35  ;;  %v1651_v35 = vld [vmem:[%s2392_s3 + $0x14] sm:$0xf] }
 0x117   :  { %v528_v54 = vmax.f32 %v470_v49, 0.0  ;;  %v524_v3 = vmax.f32 %v460_v0, 0.0  ;;  %v541_v49 = vmax.f32 %v502_v20, 0.0  ;;  %v1664_v0 = vld [vmem:[%s2392_s3 + $0x74] sm:$0xf0] }
 0x118   :  { %v540_v46 = vmax.f32 %v500_v37, 0.0  ;;  %v1653_v20 = vld [vmem:[%s2392_s3 + $0x24] sm:$0xf] }
 0x119   :  { %v551_v6 = vpack.c.bf16 %v525_v19, %v524_v3 }
 0x11a   :  { %v559_v38 = vpack.c.bf16 %v541_v49, %v540_v46  ;;  %v1532_v46 = vld [vmem:[%s2392_s3 + $0x48] sm:$0xf0] }
 0x11c   :  { %v471_v50 = vpop.f32.mrf.mxu0 }
 0x11d   :  { %v472_v52 = vadd.f32 %v471_v50, %v2008_v9  ;;  %v457_v9 = vadd.f32 %v456_v34, %v2066_v33  ;;  %v1660_v34 = vld [vmem:[%s2392_s3 + $0x54] sm:$0xf0]  ;;  %v249_v19 = vpop.permute.xlu2 %248 }
 0x11f   :  { %v529_v56 = vmax.f32 %v472_v52, 0.0  ;;  %v523_v13 = vmax.f32 %v457_v9, 0.0  ;;  %v1662_v52 = vld [vmem:[%s2392_s3 + $0x64] sm:$0xf0] }
 0x121   :  { %v553_v61 = vpack.c.bf16 %v529_v56, %v528_v54  ;;  %v550_v16 = vpack.c.bf16 %v523_v13, %v522_v8  ;;  %v1507_v54 = vor.u32 %v1652_v41, %v1506_v21  ;;  %v1522_v13 = vld [vmem:[%s2392_s3 + $0x30] sm:$0xf] }
 0x123   :  { %754 = vmatpush.bf16.msra.mxu1 %v553_v61  ;;  %1689 = vmatpush.bf16.msra.mxu2 %v553_v61  ;;  %v1554_v61 = vld [vmem:[%s2392_s3 + $0x70] sm:$0xf] }
 0x124   :  { %v474_v25 = vpop.f32.mrf.mxu0  ;;  %v1555_v9 = vor.u32 %v1664_v0, %v1554_v61  ;;  %v1663_v0 = vld [vmem:[%s2392_s3 + $0x74] sm:$0xf] }
 0x125   :  { %v475_v10 = vadd.f32 %v474_v25, %v204_v7  ;;  %v1515_v25 = vor.u32 %v1654_v59, %v1514_v58  ;;  %v224_v2 = vpop.permute.xlu2 %223 }
 0x127   :  { %755 = vmatpush.bf16.msra.mxu1 %v552_v1  ;;  %1690 = vmatpush.bf16.msra.mxu2 %v552_v1  ;;  %v530_v33 = vmax.f32 %v475_v10, 0.0  ;;  %v1523_v10 = vor.u32 %v1656_v5, %v1522_v13 }
 0x12b   :  { %756 = vmatpush.bf16.msra.mxu1 %v551_v6  ;;  %1691 = vmatpush.bf16.msra.mxu2 %v551_v6 }
 0x12c   :  { %v476_v11 = vpop.f32.mrf.mxu0 }
 0x12d   :  { %v477_v12 = vadd.f32 %v476_v11, %v209_v4  ;;  %v219_v22 = vpop.permute.xlu2 %218 }
 0x12f   :  { %v531_v17 = vmax.f32 %v477_v12, 0.0  ;;  %757 = vmatpush.bf16.msra.mxu1 %v550_v16  ;;  %1692 = vmatpush.bf16.msra.mxu2 %v550_v16 }
 0x131   :  { %v2166_v14 = vpack.c.bf16 %v531_v17, %v530_v33 }
 0x133   :  { %758 = vmatpush.bf16.msra.mxu1 %v2137_v30  ;;  %1693 = vmatpush.bf16.msra.mxu2 %v2137_v30  ;;  %v1650_v30 = vld [vmem:[%s2392_s3 + $0x4] sm:$0xf0] }
 0x134   :  { %v2170_v23 = vpop.f32.mrf.mxu0  ;;  %v1499_v42 = vor.u32 %v1650_v30, %v1498_v32  ;;  %v1658_v32 = vld [vmem:[%s2392_s3 + $0x44] sm:$0xf0] }
 0x137   :  { %759 = vmatpush.bf16.msra.mxu1 %v2124_v15  ;;  %1694 = vmatpush.bf16.msra.mxu2 %v2124_v15  ;;  %v1538_v15 = vld [vmem:[%s2392_s3 + $0x50] sm:$0xf] }
 0x138   :  { %v1539_v45 = vor.u32 %v1660_v34, %v1538_v15 }
 0x13b   :  { %760 = vmatpush.bf16.msra.mxu1 %v2100_v60  ;;  %1695 = vmatpush.bf16.msra.mxu2 %v2100_v60  ;;  %v542_v60 = vmax.f32 %v505_v27, 0.0 }
 0x13c   :  { %v481_v36 = vpop.f32.mrf.mxu0 }
 0x13d   :  { %v560_v50 = vpack.c.bf16 %v543_v39, %v542_v60  ;;  %v482_v24 = vadd.f32 %v481_v36, %v219_v22  ;;  %v1508_v36 = vld [vmem:[%s2392_s3 + $0x18] sm:$0xf0]  ;;  %v1516_v60 = vld [vmem:[%s2392_s3 + $0x28] sm:$0xf0]  ;;  %v1655_v39 = vld [vmem:[%s2392_s3 + $0x34] sm:$0xf] }
 0x13e   :  { %v1511_v37 = vor.u32 %v1651_v35, %v1508_v36 }
 0x13f   :  { %761 = vmatpush.bf16.msra.mxu1 %v2077_v44  ;;  %1696 = vmatpush.bf16.msra.mxu2 %v2077_v44  ;;  %v1546_v44 = vld [vmem:[%s2392_s3 + $0x60] sm:$0xf] }
 0x140   :  { %v1547_v55 = vor.u32 %v1662_v52, %v1546_v44  ;;  %v2276_v44 = vpop.permute.xlu2 %666  ;;  %v2278_v52 = vpop.permute.xlu1 %656 }
 0x142   :  { %762 = vmatmul.bf16.vlgmr.msra.gmra.mxu1 %v1499_v42  ;;  %787 = vmatmul.bf16.vlgmr.msra.gmra.mxu2 %v1539_v45  ;;  %v1657_v45 = vld [vmem:[%s2392_s3 + $0x44] sm:$0xf] }
 0x143   :  { %803 = vmatpush.bf16.msrb.mxu2 %v561_v40  ;;  %v1524_v40 = vld [vmem:[%s2392_s3 + $0x38] sm:$0xf0]  ;;  %v1535_v49 = vor.u32 %v1657_v45, %v1532_v46 }
 0x144   :  { %v484_v51 = vpop.f32.mrf.mxu0  ;;  %v1527_v42 = vor.u32 %v1655_v39, %v1524_v40 }
 0x145   :  { %v485_v17 = vadd.f32 %v484_v51, %v224_v2  ;;  %v1659_v51 = vld [vmem:[%s2392_s3 + $0x54] sm:$0xf] }
 0x147   :  { %804 = vmatpush.bf16.msrb.mxu2 %v560_v50  ;;  %v534_v28 = vmax.f32 %v485_v17, 0.0 }
 0x148   :  { %v2288_v58 = vpop.permute.xlu2 %661  ;;  %v2290_v59 = vpop.permute.xlu1 %651 }
 0x14b   :  { %805 = vmatpush.bf16.msrb.mxu2 %v559_v38  ;;  %v1540_v38 = vld [vmem:[%s2392_s3 + $0x58] sm:$0xf0] }
 0x14c   :  { %v486_v53 = vpop.f32.mrf.mxu0  ;;  %v1543_v21 = vor.u32 %v1659_v51, %v1540_v38 }
 0x14d   :  { %v487_v16 = vadd.f32 %v486_v53, %v2158_v57  ;;  %v1530_v57 = vld [vmem:[%s2392_s3 + $0x40] sm:$0xf]  ;;  %v1661_v53 = vld [vmem:[%s2392_s3 + $0x64] sm:$0xf] }
 0x14e   :  { %v1531_v15 = vor.u32 %v1658_v32, %v1530_v57 }
 0x14f   :  { %v535_v26 = vmax.f32 %v487_v16, 0.0 }
 0x151   :  { %v556_v29 = vpack.c.bf16 %v535_v26, %v534_v28 }
 0x152   :  { %767 = vmatmul.bf16.gmra.mxu1 %v1507_v54  ;;  %792 = vmatmul.bf16.gmra.mxu2 %v1547_v55  ;;  %v1548_v54 = vld [vmem:[%s2392_s3 + $0x68] sm:$0xf0] }
 0x153   :  { %v1551_v55 = vor.u32 %v1661_v53, %v1548_v54 }
 0x154   :  { %v489_v56 = vpop.f32.mrf.mxu0 }
 0x155   :  { %v490_v4 = vadd.f32 %v489_v56, %v2150_v47  ;;  %v533_v47 = vmax.f32 %v482_v24, 0.0 }
 0x157   :  { %v536_v18 = vmax.f32 %v490_v4, 0.0 }
 0x15c   :  { %v491_v63 = vpop.f32.mrf.mxu0 }
 0x15d   :  { %v492_v7 = vadd.f32 %v491_v63, %v2152_v48  ;;  %v480_v48 = vadd.f32 %v2170_v23, %v2161_v62  ;;  %v1649_v62 = vld [vmem:[%s2392_s3 + $0x4] sm:$0xf]  ;;  %v1500_v23 = vld [vmem:[%s2392_s3 + $0x8] sm:$0xf0]  ;;  %v1556_v63 = vld [vmem:[%s2392_s3 + $0x78] sm:$0xf0] }
 0x15e   :  { %v1503_v34 = vor.u32 %v1649_v62, %v1500_v23 }
 0x15f   :  { %v532_v31 = vmax.f32 %v480_v48, 0.0 }
 0x161   :  { %v555_v30 = vpack.c.bf16 %v533_v47, %v532_v31 }
 0x162   :  { %772 = vmatmul.bf16.gmra.mxu1 %v1515_v25  ;;  %797 = vmatmul.bf16.gmra.mxu2 %v1555_v9  ;;  %v2300_v25 = vpop.permute.xlu2 %636  ;;  %v1559_v9 = vor.u32 %v1663_v0, %v1556_v63 }
 0x164   :  { %v494_v1 = vpop.f32.mrf.mxu0 }
 0x165   :  { %v495_v3 = vadd.f32 %v494_v1, %v2148_v43  ;;  %v537_v43 = vmax.f32 %v492_v7, 0.0  ;;  %v2302_v1 = vpop.permute.xlu0 %671 }
 0x167   :  { %v538_v11 = vmax.f32 %v495_v3, 0.0  ;;  %v557_v27 = vpack.c.bf16 %v537_v43, %v536_v18 }
 0x16a   :  { %v632_v13 = vpop.permute.xlu2 %631 }
 0x16c   :  { %v496_v6 = vpop.f32.mrf.mxu0 }
 0x16d   :  { %v497_v8 = vadd.f32 %v496_v6, %v249_v19  ;;  %v627_v19 = vpop.permute.xlu1 %626  ;;  %v647_v6 = vpop.permute.xlu0 %646 }
 0x16f   :  { %v539_v12 = vmax.f32 %v497_v8, 0.0 }
 0x171   :  { %v558_v33 = vpack.c.bf16 %v539_v12, %v538_v11 }
 0x172   :  { %777 = vmatmul.bf16.gmra.mxu1 %v1523_v10  ;;  %v607_v10 = vpop.permute.xlu2 %606 }
 0x173   :  { %806 = vmatpush.bf16.msrb.mxu2 %v558_v33 }
 0x175   :  { %v622_v5 = vpop.permute.xlu1 %621  ;;  %v2308_v43 = vpop.permute.xlu0 %641 }
 0x177   :  { %807 = vmatpush.bf16.msrb.mxu2 %v557_v27 }
 0x17a   :  { %v602_v17 = vpop.permute.xlu2 %601 }
 0x17b   :  { %808 = vmatpush.bf16.msrb.mxu2 %v556_v29 }
 0x17d   :  { %v597_v4 = vpop.permute.xlu1 %596  ;;  %v617_v48 = vpop.permute.xlu0 %616 }
 0x17f   :  { %809 = vmatpush.bf16.msrb.mxu2 %v555_v30 }
 0x182   :  { %782 = vmatmul.bf16.gmra.mxu1 %v1531_v15 }
 0x183   :  { %810 = vmatpush.bf16.msrb.mxu2 %v2166_v14  ;;  %v1519_v14 = vor.u32 %v1653_v20, %v1516_v60 }
 0x185   :  { %v612_v32 = vpop.permute.xlu0 %611 }
 0x186   :  { %811 = vmatmul.bf16.vlgmr.msrb.gmra.mxu2 %v1503_v34 }
 0x196   :  { %816 = vmatmul.bf16.gmra.mxu2 %v1511_v37 }
 0x1a6   :  { %821 = vmatmul.bf16.gmra.mxu2 %v1519_v14 }
 0x1b6   :  { %826 = vmatmul.bf16.gmra.mxu2 %v1527_v42 }
 0x1bf   :  { %v763_v2 = vpop.f32.mrf.mxu1 }
 0x1c0   :  { %v764_v11 = vadd.f32 %v763_v2, %v597_v4 }
 0x1c5   :  { %v2266_v50 = vpop.f32.mrf.mxu2 }
 0x1c6   :  { %831 = vmatmul.bf16.gmra.mxu2 %v1535_v49 }
 0x1c7   :  { %v765_v7 = vpop.f32.mrf.mxu1 }
 0x1c8   :  { %v766_v18 = vadd.f32 %v765_v7, %v602_v17 }
 0x1cd   :  { %v2274_v41 = vpop.f32.mrf.mxu2 }
 0x1cf   :  { %v768_v33 = vpop.f32.mrf.mxu1 }
 0x1d0   :  { %v769_v29 = vadd.f32 %v768_v33, %v607_v10 }
 0x1d5   :  { %v2286_v56 = vpop.f32.mrf.mxu2 }
 0x1d6   :  { %836 = vmatmul.bf16.gmra.mxu2 %v1543_v21 }
 0x1d7   :  { %v770_v28 = vpop.f32.mrf.mxu1 }
 0x1d8   :  { %v771_v15 = vadd.f32 %v770_v28, %v612_v32 }
 0x1dd   :  { %v2292_v61 = vpop.f32.mrf.mxu2 }
 0x1df   :  { %v773_v30 = vpop.f32.mrf.mxu1 }
 0x1e0   :  { %v774_v60 = vadd.f32 %v773_v30, %v617_v48 }
 0x1e5   :  { %v2304_v3 = vpop.f32.mrf.mxu2 }
 0x1e6   :  { %841 = vmatmul.bf16.gmra.mxu2 %v1551_v55 }
 0x1e7   :  { %v775_v37 = vpop.f32.mrf.mxu1 }
 0x1e8   :  { %v776_v14 = vadd.f32 %v775_v37, %v622_v5 }
 0x1ed   :  { %v2306_v8 = vpop.f32.mrf.mxu2 }
 0x1ef   :  { %v778_v45 = vpop.f32.mrf.mxu1 }
 0x1f0   :  { %v779_v53 = vadd.f32 %v778_v45, %v627_v19 }
 0x1f6   :  { %846 = vmatmul.bf16.gmra.mxu2 %v1559_v9 }
 0x1f7   :  { %v780_v21 = vpop.f32.mrf.mxu1 }
 0x1f8   :  { %v781_v54 = vadd.f32 %v780_v21, %v632_v13 }
 0x209   :  { %v812_v12 = vpop.f32.mrf.mxu2 }
 0x20a   :  { %v813_v16 = vadd.f32 %v812_v12, %v764_v11  ;;  %v789_v11 = vadd.f32 %v2266_v50, %v647_v6  ;;  %v791_v12 = vadd.f32 %v2274_v41, %v2290_v59  ;;  %v783_v59 = vpop.f32.mrf.mxu1 }
 0x20c   :  { %v852_v26 = vmax.f32 %v813_v16, 0.0 }
 0x211   :  { %v814_v22 = vpop.f32.mrf.mxu2 }
 0x212   :  { %v815_v24 = vadd.f32 %v814_v22, %v766_v18 }
 0x214   :  { %v853_v27 = vmax.f32 %v815_v24, 0.0  ;;  %v794_v24 = vadd.f32 %v2286_v56, %v2278_v52 }
 0x216   :  { %v2310_v47 = vpack.c.bf16 %v853_v27, %v852_v26  ;;  %v796_v26 = vadd.f32 %v2292_v61, %v2288_v58  ;;  %v785_v58 = vpop.f32.mrf.mxu1 }
 0x219   :  { %v817_v31 = vpop.f32.mrf.mxu2 }
 0x21a   :  { %v818_v57 = vadd.f32 %v817_v31, %v769_v29  ;;  %v799_v31 = vadd.f32 %v2304_v3, %v2276_v44 }
 0x21c   :  { %v854_v34 = vmax.f32 %v818_v57, 0.0  ;;  %v801_v57 = vadd.f32 %v2306_v8, %v2302_v1  ;;  %v1665_v1 = vld [vmem:[%s2394_s5] sm:$0xff]  ;;  %v1667_v8 = vld [vmem:[%s2394_s5 + $0x10] sm:$0xff] }
 0x221   :  { %v819_v62 = vpop.f32.mrf.mxu2 }
 0x222   :  { %v820_v23 = vadd.f32 %v819_v62, %v771_v15  ;;  %v786_v62 = vadd.f32 %v785_v58, %v2308_v43  ;;  %v1668_v43 = vld [vmem:[%s2394_s5 + $0x18] sm:$0xff] }
 0x224   :  { %v855_v35 = vmax.f32 %v820_v23, 0.0  ;;  %v784_v23 = vadd.f32 %v783_v59, %v2300_v25  ;;  %v1666_v25 = vld [vmem:[%s2394_s5 + $0x8] sm:$0xff] }
 0x226   :  { %v2312_v36 = vpack.c.bf16 %v855_v35, %v854_v34 }
 0x229   :  { %v822_v20 = vpop.f32.mrf.mxu2 }
 0x22a   :  { %v823_v39 = vadd.f32 %v822_v20, %v774_v60  ;;  %v981_v20 = vpop.permute.xlu0 %980  ;;  %v1671_v60 = vld [vmem:[%s2394_s5 + $0x30] sm:$0xff] }
 0x22c   :  { %v856_v46 = vmax.f32 %v823_v39, 0.0 }
 0x231   :  { %v824_v40 = vpop.f32.mrf.mxu2 }
 0x232   :  { %v825_v42 = vadd.f32 %v824_v40, %v776_v14  ;;  %v971_v14 = vpop.permute.xlu2 %970  ;;  %v976_v39 = vpop.permute.xlu0 %975 }
 0x234   :  { %v857_v49 = vmax.f32 %v825_v42, 0.0  ;;  %v1672_v42 = vld [vmem:[%s2394_s5 + $0x38] sm:$0xff] }
 0x236   :  { %v870_v51 = vpack.c.bf16 %v857_v49, %v856_v46  ;;  %v986_v46 = vpop.permute.xlu1 %985 }
 0x239   :  { %v827_v38 = vpop.f32.mrf.mxu2 }
 0x23a   :  { %v828_v55 = vadd.f32 %v827_v38, %v779_v53  ;;  %v966_v40 = vpop.permute.xlu2 %965  ;;  %v2353_v45 = vpop.permute.xlu0 %950 }
 0x23c   :  { %v858_v9 = vmax.f32 %v828_v55, 0.0 }
 0x23e   :  { %v961_v38 = vpop.permute.xlu1 %960 }
 0x241   :  { %v829_v0 = vpop.f32.mrf.mxu2 }
 0x242   :  { %v830_v63 = vadd.f32 %v829_v0, %v781_v54  ;;  %v941_v49 = vpop.permute.xlu2 %940 }
 0x244   :  { %v859_v2 = vmax.f32 %v830_v63, 0.0 }
 0x246   :  { %v871_v7 = vpack.c.bf16 %v859_v2, %v858_v9  ;;  %v956_v55 = vpop.permute.xlu1 %955 }
 0x249   :  { %v832_v10 = vpop.f32.mrf.mxu2 }
 0x24a   :  { %v833_v35 = vadd.f32 %v832_v10, %v784_v23  ;;  %v936_v21 = vpop.permute.xlu2 %935 }
 0x24c   :  { %v860_v44 = vmax.f32 %v833_v35, 0.0 }
 0x251   :  { %v834_v4 = vpop.f32.mrf.mxu2 }
 0x252   :  { %v835_v34 = vadd.f32 %v834_v4, %v786_v62  ;;  %v911_v0 = vpop.permute.xlu2 %910 }
 0x254   :  { %v861_v37 = vmax.f32 %v835_v34, 0.0 }
 0x256   :  { %v872_v3 = vpack.c.bf16 %v861_v37, %v860_v44 }
 0x259   :  { %v837_v5 = vpop.f32.mrf.mxu2 }
 0x25a   :  { %v838_v16 = vadd.f32 %v837_v5, %v789_v11  ;;  %v931_v11 = vpop.permute.xlu1 %930 }
 0x25c   :  { %v862_v18 = vmax.f32 %v838_v16, 0.0 }
 0x261   :  { %v839_v33 = vpop.f32.mrf.mxu2 }
 0x262   :  { %v840_v17 = vadd.f32 %v839_v33, %v791_v12  ;;  %v926_v33 = vpop.permute.xlu1 %925 }
 0x264   :  { %v863_v19 = vmax.f32 %v840_v17, 0.0 }
 0x266   :  { %v873_v13 = vpack.c.bf16 %v863_v19, %v862_v18 }
 0x269   :  { %v842_v22 = vpop.f32.mrf.mxu2 }
 0x26a   :  { %v843_v27 = vadd.f32 %v842_v22, %v794_v24 }
 0x26c   :  { %v864_v50 = vmax.f32 %v843_v27, 0.0 }
 0x271   :  { %v844_v48 = vpop.f32.mrf.mxu2 }
 0x272   :  { %v845_v28 = vadd.f32 %v844_v48, %v796_v26 }
 0x274   :  { %v865_v6 = vmax.f32 %v845_v28, 0.0 }
 0x276   :  { %v874_v29 = vpack.c.bf16 %v865_v6, %v864_v50 }
 0x279   :  { %v847_v41 = vpop.f32.mrf.mxu2 }
 0x27a   :  { %v848_v32 = vadd.f32 %v847_v41, %v799_v31 }
 0x27c   :  { %v866_v56 = vmax.f32 %v848_v32, 0.0 }
 0x281   :  { %v849_v30 = vpop.f32.mrf.mxu2 }
 0x282   :  { %v850_v52 = vadd.f32 %v849_v30, %v801_v57 }
 0x284   :  { %v867_v15 = vmax.f32 %v850_v52, 0.0 }
 0x286   :  { %v875_v61 = vpack.c.bf16 %v867_v15, %v866_v56 }
 0x288   :  { %1036 = vmatpush.bf16.msrb.mxu3 %v875_v61 }
 0x28c   :  { %1037 = vmatpush.bf16.msrb.mxu3 %v874_v29 }
 0x290   :  { %1038 = vmatpush.bf16.msrb.mxu3 %v873_v13 }
 0x294   :  { %1039 = vmatpush.bf16.msrb.mxu3 %v872_v3 }
 0x298   :  { %1040 = vmatpush.bf16.msrb.mxu3 %v871_v7 }
 0x29c   :  { %1041 = vmatpush.bf16.msrb.mxu3 %v870_v51  ;;  %v946_v51 = vpop.permute.xlu0 %945 }
 0x2a0   :  { %1042 = vmatpush.bf16.msrb.mxu3 %v2312_v36  ;;  %v1670_v36 = vld [vmem:[%s2394_s5 + $0x28] sm:$0xff] }
 0x2a4   :  { %1043 = vmatpush.bf16.msrb.mxu3 %v2310_v47  ;;  %v1669_v47 = vld [vmem:[%s2394_s5 + $0x20] sm:$0xff]  ;;  %v921_v53 = vpop.permute.xlu0 %920 }
 0x2a7   :  { %1044 = vmatmul.bf16.vlgmr.msrb.gmra.mxu3 %v1665_v1 }
 0x2ac   :  { %v916_v9 = vpop.permute.xlu0 %915 }
 0x2b7   :  { %1049 = vmatmul.bf16.gmra.mxu3 %v1666_v25 }
 0x2c7   :  { %1054 = vmatmul.bf16.gmra.mxu3 %v1667_v8 }
 0x2d7   :  { %1059 = vmatmul.bf16.gmra.mxu3 %v1668_v43 }
 0x2e7   :  { %1064 = vmatmul.bf16.gmra.mxu3 %v1669_v47 }
 0x2f7   :  { %1069 = vmatmul.bf16.gmra.mxu3 %v1670_v36 }
 0x307   :  { %1074 = vmatmul.bf16.gmra.mxu3 %v1671_v60 }
 0x317   :  { %1079 = vmatmul.bf16.gmra.mxu3 %v1672_v42 }
 0x32a   :  { %v1045_v54 = vpop.f32.mrf.mxu3 }
 0x32b   :  { %v1046_v63 = vadd.f32 %v1045_v54, %v911_v0  ;;  %v1678_v0 = vld [vmem:[%s2396_s7 + $0x28] sm:$0xff] }
 0x32d   :  { %v1085_v10 = vmax.f32 %v1046_v63, 0.0  ;;  %v1214_v63 = vpop.permute.xlu1 %1213 }
 0x332   :  { %v1047_v2 = vpop.f32.mrf.mxu3 }
 0x333   :  { %v1048_v7 = vadd.f32 %v1047_v2, %v916_v9  ;;  %v1204_v9 = vpop.permute.xlu0 %1203  ;;  %v1679_v2 = vld [vmem:[%s2396_s7 + $0x30] sm:$0xff] }
 0x335   :  { %v1086_v4 = vmax.f32 %v1048_v7, 0.0  ;;  %v1209_v7 = vpop.permute.xlu1 %1208 }
 0x337   :  { %v1101_v5 = vpack.c.bf16 %v1086_v4, %v1085_v10 }
 0x33a   :  { %v1050_v12 = vpop.f32.mrf.mxu3 }
 0x33b   :  { %v1051_v16 = vadd.f32 %v1050_v12, %v921_v53  ;;  %v1199_v10 = vpop.permute.xlu0 %1198 }
 0x33d   :  { %v1087_v19 = vmax.f32 %v1051_v16, 0.0  ;;  %v2377_v4 = vpop.permute.xlu1 %1183 }
 0x342   :  { %v1052_v17 = vpop.f32.mrf.mxu3 }
 0x343   :  { %v1053_v18 = vadd.f32 %v1052_v17, %v926_v33  ;;  %v1174_v12 = vpop.permute.xlu0 %1173 }
 0x345   :  { %v1088_v13 = vmax.f32 %v1053_v18, 0.0  ;;  %v1179_v16 = vpop.permute.xlu1 %1178 }
 0x347   :  { %v1102_v22 = vpack.c.bf16 %v1088_v13, %v1087_v19 }
 0x34a   :  { %v1055_v24 = vpop.f32.mrf.mxu3 }
 0x34b   :  { %v1056_v26 = vadd.f32 %v1055_v24, %v931_v11  ;;  %v1219_v11 = vpop.permute.xlu2 %1218  ;;  %v1169_v17 = vpop.permute.xlu0 %1168 }
 0x34d   :  { %v1089_v28 = vmax.f32 %v1056_v26, 0.0  ;;  %v1154_v18 = vpop.permute.xlu1 %1153 }
 0x352   :  { %v1057_v27 = vpop.f32.mrf.mxu3 }
 0x353   :  { %v1058_v48 = vadd.f32 %v1057_v27, %v936_v21  ;;  %v1194_v33 = vpop.permute.xlu2 %1193 }
 0x355   :  { %v1090_v50 = vmax.f32 %v1058_v48, 0.0  ;;  %v1149_v26 = vpop.permute.xlu1 %1148 }
 0x357   :  { %v1103_v6 = vpack.c.bf16 %v1090_v50, %v1089_v28 }
 0x35a   :  { %v1060_v29 = vpop.f32.mrf.mxu3 }
 0x35b   :  { %v1061_v41 = vadd.f32 %v1060_v29, %v941_v49  ;;  %v1189_v13 = vpop.permute.xlu2 %1188 }
 0x35d   :  { %v1091_v57 = vmax.f32 %v1061_v41, 0.0 }
 0x362   :  { %v1062_v59 = vpop.f32.mrf.mxu3 }
 0x363   :  { %v1063_v31 = vadd.f32 %v1062_v59, %v946_v51  ;;  %v1164_v29 = vpop.permute.xlu2 %1163 }
 0x365   :  { %v1092_v32 = vmax.f32 %v1063_v31, 0.0 }
 0x367   :  { %v1104_v30 = vpack.c.bf16 %v1092_v32, %v1091_v57 }
 0x36a   :  { %v1065_v52 = vpop.f32.mrf.mxu3 }
 0x36b   :  { %v1066_v21 = vadd.f32 %v1065_v52, %v2353_v45  ;;  %v1674_v45 = vld [vmem:[%s2396_s7 + $0x8] sm:$0xff]  ;;  %v1159_v31 = vpop.permute.xlu2 %1158 }
 0x372   :  { %v1067_v56 = vpop.f32.mrf.mxu3 }
 0x373   :  { %v1068_v42 = vadd.f32 %v1067_v56, %v956_v55  ;;  %v1677_v55 = vld [vmem:[%s2396_s7 + $0x20] sm:$0xff] }
 0x37a   :  { %v1070_v15 = vpop.f32.mrf.mxu3 }
 0x37b   :  { %v1071_v36 = vadd.f32 %v1070_v15, %v961_v38  ;;  %v1676_v38 = vld [vmem:[%s2396_s7 + $0x18] sm:$0xff] }
 0x37d   :  { %v1095_v53 = vmax.f32 %v1071_v36, 0.0 }
 0x382   :  { %v1072_v58 = vpop.f32.mrf.mxu3 }
 0x383   :  { %v1073_v8 = vadd.f32 %v1072_v58, %v966_v40  ;;  %v1673_v40 = vld [vmem:[%s2396_s7] sm:$0xff] }
 0x385   :  { %v1096_v49 = vmax.f32 %v1073_v8, 0.0 }
 0x387   :  { %v1106_v54 = vpack.c.bf16 %v1096_v49, %v1095_v53 }
 0x38a   :  { %v1075_v61 = vpop.f32.mrf.mxu3 }
 0x38b   :  { %v1076_v3 = vadd.f32 %v1075_v61, %v971_v14 }
 0x38d   :  { %v1097_v60 = vmax.f32 %v1076_v3, 0.0 }
 0x392   :  { %v1077_v62 = vpop.f32.mrf.mxu3 }
 0x393   :  { %v1078_v37 = vadd.f32 %v1077_v62, %v976_v39  ;;  %v1093_v39 = vmax.f32 %v1066_v21, 0.0 }
 0x395   :  { %v1098_v43 = vmax.f32 %v1078_v37, 0.0 }
 0x397   :  { %v1107_v51 = vpack.c.bf16 %v1098_v43, %v1097_v60 }
 0x39a   :  { %v1080_v23 = vpop.f32.mrf.mxu3 }
 0x39b   :  { %v1081_v34 = vadd.f32 %v1080_v23, %v981_v20  ;;  %v1094_v20 = vmax.f32 %v1068_v42, 0.0 }
 0x39d   :  { %v1099_v1 = vmax.f32 %v1081_v34, 0.0  ;;  %v1105_v14 = vpack.c.bf16 %v1094_v20, %v1093_v39 }
 0x3a2   :  { %v1082_v35 = vpop.f32.mrf.mxu3 }
 0x3a3   :  { %v1083_v44 = vadd.f32 %v1082_v35, %v986_v46  ;;  %v1675_v46 = vld [vmem:[%s2396_s7 + $0x10] sm:$0xff] }
 0x3a5   :  { %v1100_v25 = vmax.f32 %v1083_v44, 0.0 }
 0x3a7   :  { %v1108_v47 = vpack.c.bf16 %v1100_v25, %v1099_v1 }
 0x3a9   :  { %1269 = vmatpush.bf16.msrb.mxu1 %v1108_v47 }
 0x3ad   :  { %1270 = vmatpush.bf16.msrb.mxu1 %v1107_v51 }
 0x3b1   :  { %1271 = vmatpush.bf16.msrb.mxu1 %v1106_v54 }
 0x3b5   :  { %1272 = vmatpush.bf16.msrb.mxu1 %v1105_v14 }
 0x3b9   :  { %1273 = vmatpush.bf16.msrb.mxu1 %v1104_v30 }
 0x3bd   :  { %1274 = vmatpush.bf16.msrb.mxu1 %v1103_v6 }
 0x3c1   :  { %1275 = vmatpush.bf16.msrb.mxu1 %v1102_v22  ;;  %v1144_v22 = vpop.permute.xlu0 %1143 }
 0x3c5   :  { %1276 = vmatpush.bf16.msrb.mxu1 %v1101_v5  ;;  %v1680_v5 = vld [vmem:[%s2396_s7 + $0x38] sm:$0xff] }
 0x3c8   :  { %1277 = vmatmul.bf16.vlgmr.msrb.gmra.mxu1 %v1673_v40 }
 0x3d8   :  { %1282 = vmatmul.bf16.gmra.mxu1 %v1674_v45 }
 0x3e8   :  { %1287 = vmatmul.bf16.gmra.mxu1 %v1675_v46 }
 0x3f8   :  { %1292 = vmatmul.bf16.gmra.mxu1 %v1676_v38 }
 0x408   :  { %1297 = vmatmul.bf16.gmra.mxu1 %v1677_v55 }
 0x418   :  { %1302 = vmatmul.bf16.gmra.mxu1 %v1678_v0 }
 0x428   :  { %1307 = vmatmul.bf16.gmra.mxu1 %v1679_v2 }
 0x438   :  { %1312 = vmatmul.bf16.gmra.mxu1 %v1680_v5 }
 0x445   :  { %v1278_v19 = vpop.f32.mrf.mxu1 }
 0x446   :  { %v1279_v24 = vadd.f32 %v1278_v19, %v1144_v22 }
 0x448   :  { %v1318_v28 = vmax.f32 %v1279_v24, 0.0 }
 0x44d   :  { %v1280_v27 = vpop.f32.mrf.mxu1 }
 0x44e   :  { %v1281_v48 = vadd.f32 %v1280_v27, %v1149_v26 }
 0x450   :  { %v1319_v50 = vmax.f32 %v1281_v48, 0.0 }
 0x452   :  { %v1334_v6 = vpack.c.bf16 %v1319_v50, %v1318_v28 }
 0x455   :  { %v1283_v41 = vpop.f32.mrf.mxu1 }
 0x456   :  { %v1284_v59 = vadd.f32 %v1283_v41, %v1154_v18 }
 0x458   :  { %v1320_v30 = vmax.f32 %v1284_v59, 0.0 }
 0x45d   :  { %v1285_v57 = vpop.f32.mrf.mxu1 }
 0x45e   :  { %v1286_v32 = vadd.f32 %v1285_v57, %v1159_v31 }
 0x460   :  { %v1321_v52 = vmax.f32 %v1286_v32, 0.0 }
 0x462   :  { %v1335_v56 = vpack.c.bf16 %v1321_v52, %v1320_v30 }
 0x465   :  { %v1288_v15 = vpop.f32.mrf.mxu1 }
 0x466   :  { %v1289_v58 = vadd.f32 %v1288_v15, %v1164_v29 }
 0x468   :  { %v1322_v23 = vmax.f32 %v1289_v58, 0.0 }
 0x46d   :  { %v1290_v61 = vpop.f32.mrf.mxu1 }
 0x46e   :  { %v1291_v62 = vadd.f32 %v1290_v61, %v1169_v17 }
 0x470   :  { %v1323_v34 = vmax.f32 %v1291_v62, 0.0 }
 0x472   :  { %v1336_v35 = vpack.c.bf16 %v1323_v34, %v1322_v23 }
 0x475   :  { %v1293_v37 = vpop.f32.mrf.mxu1 }
 0x476   :  { %v1294_v44 = vadd.f32 %v1293_v37, %v1174_v12 }
 0x478   :  { %v1324_v25 = vmax.f32 %v1294_v44, 0.0 }
 0x47d   :  { %v1295_v3 = vpop.f32.mrf.mxu1 }
 0x47e   :  { %v1296_v1 = vadd.f32 %v1295_v3, %v1179_v16 }
 0x480   :  { %v1325_v8 = vmax.f32 %v1296_v1, 0.0 }
 0x482   :  { %v1337_v43 = vpack.c.bf16 %v1325_v8, %v1324_v25 }
 0x485   :  { %v1298_v47 = vpop.f32.mrf.mxu1 }
 0x486   :  { %v1299_v17 = vadd.f32 %v1298_v47, %v2377_v4 }
 0x48d   :  { %v1300_v36 = vpop.f32.mrf.mxu1 }
 0x48e   :  { %v1301_v5 = vadd.f32 %v1300_v36, %v1189_v13 }
 0x495   :  { %v1303_v60 = vpop.f32.mrf.mxu1 }
 0x496   :  { %v1304_v0 = vadd.f32 %v1303_v60, %v1194_v33 }
 0x498   :  { %v1328_v18 = vmax.f32 %v1304_v0, 0.0 }
 0x49d   :  { %v1305_v42 = vpop.f32.mrf.mxu1 }
 0x49e   :  { %v1306_v46 = vadd.f32 %v1305_v42, %v1199_v10  ;;  %v1342_v10 = vld [vmem:[%s2398_s9] sm:$0xf]  ;;  %s1389_s9 = sshll.u32 %s1733_s6, 4  ;;  %s1390_s9 = int_to_ptr.vmem [resolvable:$true] %s1389_s9 }
 0x4a0   :  { %v1329_v12 = vmax.f32 %v1306_v46, 0.0 }
 0x4a2   :  { %v1339_v19 = vpack.c.bf16 %v1329_v12, %v1328_v18 }
 0x4a5   :  { %v1308_v49 = vpop.f32.mrf.mxu1 }
 0x4a6   :  { %v1309_v14 = vadd.f32 %v1308_v49, %v1204_v9 }
 0x4a8   :  { %v1330_v2 = vmax.f32 %v1309_v14, 0.0 }
 0x4ad   :  { %v1310_v51 = vpop.f32.mrf.mxu1 }
 0x4ae   :  { %v1311_v54 = vadd.f32 %v1310_v51, %v1209_v7  ;;  %v1326_v7 = vmax.f32 %v1299_v17, 0.0 }
 0x4b0   :  { %v1331_v38 = vmax.f32 %v1311_v54, 0.0 }
 0x4b2   :  { %v1340_v16 = vpack.c.bf16 %v1331_v38, %v1330_v2 }
 0x4b5   :  { %v1313_v21 = vpop.f32.mrf.mxu1 }
 0x4b6   :  { %v1314_v53 = vadd.f32 %v1313_v21, %v1214_v63  ;;  %v1327_v63 = vmax.f32 %v1301_v5, 0.0 }
 0x4b8   :  { %v1332_v40 = vmax.f32 %v1314_v53, 0.0  ;;  %v1338_v9 = vpack.c.bf16 %v1327_v63, %v1326_v7 }
 0x4bd   :  { %v1315_v20 = vpop.f32.mrf.mxu1 }
 0x4be   :  { %v1316_v39 = vadd.f32 %v1315_v20, %v1219_v11  ;;  %v1360_v11 = vpop.permute.xlu2 %1359 }
 0x4bf   :  { %v1362_v33 = vperm.slane %v1360_v11, 0 }
 0x4c0   :  { %v1333_v45 = vmax.f32 %v1316_v39, 0.0 }
 0x4c2   :  { %v1341_v55 = vpack.c.bf16 %v1333_v45, %v1332_v40 }
 0x4c4   :  { %1343 = vmatpush.bf16.msra.mxu2 %v1341_v55 }
 0x4c8   :  { %1344 = vmatpush.bf16.msra.mxu2 %v1340_v16 }
 0x4cc   :  { %1345 = vmatpush.bf16.msra.mxu2 %v1339_v19 }
 0x4d0   :  { %1346 = vmatpush.bf16.msra.mxu2 %v1338_v9 }
 0x4d4   :  { %1347 = vmatpush.bf16.msra.mxu2 %v1337_v43 }
 0x4d8   :  { %1348 = vmatpush.bf16.msra.mxu2 %v1336_v35 }
 0x4dc   :  { %1349 = vmatpush.bf16.msra.mxu2 %v1335_v56 }
 0x4e0   :  { %1350 = vmatpush.bf16.msra.mxu2 %v1334_v6 }
 0x4e3   :  { %1351 = vmatmul.bf16.vlgmr.msra.gmra.mxu2 %v1342_v10 }
 0x566   :  { %v1352_v4 = vpop.f32.mrf.mxu2 }
 0x567   :  { %v1363_v13 = vadd.f32 %v1362_v33, %v1352_v4 }
 0x569   :  { %v1624_v22 = vmul.f32 -1.442695, %v1363_v13 }
 0x56b   :  { %1702 = vpow2.f32 %v1624_v22 }
 0x56e   :  { %v1354_v24 = vpop.f32.mrf.mxu2 }
 0x571   :  { %v1703_v26 = vpop.eup %1702 }
 0x572   :  { %v1367_v27 = vadd.f32 1.0, %v1703_v26 }
 0x574   :  { %1704 = vrcp.f32 %v1367_v27  ;;  %v1379_v29 = vand.u32 2147483648, %v1367_v27  ;;  %v1377_v41 = vand.u32 2147483647, %v1367_v27  ;;  %vm1373_vm1 = vweird.f32 %v1367_v27 }
 0x576   :  { %v1380_v31 = vor.u32 1.1754944e-38, %v1379_v29  ;;  %vm1378_vm3 = vcmp.eq.f32.partialorder %v1377_v41, 8.507059e+37 }
 0x57a   :  { %v1705_v48 = vpop.eup %1704 }
 0x57b   :  { %v1369_v28 = vmul.f32 %v1705_v48, %v1367_v27  ;;  %vm1374_vm0 = vweird.f32 %v1705_v48 }
 0x57c   :  { %vm1375_vm2 = vmor %vm1373_vm1, %vm1374_vm0 }
 0x57d   :  { %v1370_v50 = vsub.f32 1.0, %v1369_v28 }
 0x57f   :  { %v1371_v6 = vmul.f32 %v1705_v48, %v1370_v50 }
 0x581   :  { %v1372_v59 = vadd.f32 %v1705_v48, %v1371_v6 }
 0x583   :  { %v1376_v57 = vsel %vm1375_vm2, %v1705_v48, %v1372_v59 }
 0x584   :  { %v1381_v32 = vsel %vm1378_vm3, %v1380_v31, %v1376_v57 }
 0x585   :  { %1383 = vst [vmem:[#allocation3] sm:$0x1] %v1381_v32 }
 0x586   :  { %1394 = dma.vmem_to_hbm [thread:$0]  %s1390_s9, 16, %s1392_s23, [#allocation4]  }
 0x587   :  { %1730 = dma.done.wait [#allocation4], 16  }
 0x588   :  { %1731 = vsyncadd [#allocation4], 4294967280 }
 0x589   :  { %1399 = vsyncpa [#allocation4], 1 }

</bundles_post_ra>
